<compile_context>
chip_gen: v6e
topology: v6e:2x2x1
jax: 0.10.0
libtpu: 0.0.40
codegen_flags: <defaults>
</compile_context>

<pallas_src>
import functools

import jax
import jax.numpy as jnp
from jax import lax
from jax.experimental import pallas as pl
from jax.experimental.pallas import tpu as pltpu


def _epilogue_dtype():
    """bf16 epilogue on chips with a bf16 VPU (v6e/v7x); f32 on v5e and older."""
    try:
        kind = jax.devices()[0].device_kind.lower()
    except Exception:
        return jnp.float32
    if any(f"v{g}" in kind for g in (2, 3, 4, 5)):
        return jnp.float32
    return jnp.bfloat16


def mlp_kernel(x_ref, w1t_ref, b1_ref, w2t_ref, b2_ref, o_ref, *, epi_dtype):
    # x tile arrives f32 straight from HBM; cast to bf16 here (cheap, VMEM-local).
    x_bf = x_ref[...].astype(jnp.bfloat16)                      # (tm, in_dim)
    # h^T = w1^T @ x^T : contract w1t dim 1 with x dim 1 -> (hidden, tm).
    # f32 MXU accumulation; the transposed layout falls straight out of the MXU.
    h = lax.dot_general(
        w1t_ref[...], x_bf, (((1,), (1,)), ((), ())),
        preferred_element_type=jnp.float32)                     # (hidden, tm) f32
    # Bias + ReLU epilogue (bf16 on v6e/v7x, f32 on v5e); bias broadcasts over lanes.
    h = jnp.maximum(h.astype(epi_dtype) + b1_ref[...].astype(epi_dtype), 0.0)
    # o^T = w2^T @ h^T -> (out_dim, tm): lane-dense result, unmasked stores.
    o = jnp.dot(w2t_ref[...], h.astype(jnp.bfloat16),
                preferred_element_type=jnp.float32)             # (out_dim, tm) f32
    o_ref[...] = (o + b2_ref[...]).astype(o_ref.dtype)


def mlp_forward_t(x, w1, b1, w2, b2, *, tm=2048):
    """Lane-dense kernel output: returns the logits transposed, shape (out_dim, B)."""
    B, in_dim = x.shape
    hidden = w1.shape[1]
    out_dim = w2.shape[1]

    # tm is the LANE dim of the (out_dim, B) output: it must be a multiple of 128
    # (or equal the full batch).  Clamp so the "parallel" grid gets >= 2 tiles when
    # the batch allows it.  The ragged last tile is handled by Pallas (reads/writes
    # are clipped), so no padding / slicing passes in the wrapper.
    if B <= 128:
        tm = B                                            # single full-extent tile
    else:
        tm = max(128, (tm // 128) * 128)
        tm = min(tm, max(128, 128 * pl.cdiv(pl.cdiv(B, 2), 128)))
    grid = (pl.cdiv(B, tm),)

    # One-time tiny weight transposes/casts (reused across the whole batch).
    w1t = w1.T.astype(jnp.bfloat16)                       # (hidden, in_dim)
    w2t = w2.T.astype(jnp.bfloat16)                       # (out_dim, hidden)
    b1t = b1.reshape(hidden, 1)                           # f32; cast in-kernel
    b2t = b2.reshape(out_dim, 1)                          # f32

    kernel = functools.partial(mlp_kernel, epi_dtype=_epilogue_dtype())

    cp_kwargs = dict(dimension_semantics=("parallel",))
    if tm > 2048:  # bigger tiles (e.g. on v6e) need a raised scoped-VMEM limit
        cp_kwargs["vmem_limit_bytes"] = 64 * 1024 * 1024

    return pl.pallas_call(
        kernel,
        out_shape=jax.ShapeDtypeStruct((out_dim, B), jnp.float32),
        grid_spec=pl.GridSpec(
            grid=grid,
            in_specs=[
                pl.BlockSpec((tm, in_dim), lambda i: (i, 0)),       # streamed f32 x tile
                pl.BlockSpec((hidden, in_dim), lambda i: (0, 0)),   # resident weights
                pl.BlockSpec((hidden, 1), lambda i: (0, 0)),
                pl.BlockSpec((out_dim, hidden), lambda i: (0, 0)),
                pl.BlockSpec((out_dim, 1), lambda i: (0, 0)),
            ],
            out_specs=pl.BlockSpec((out_dim, tm), lambda i: (0, i)),
        ),
        compiler_params=pltpu.CompilerParams(**cp_kwargs),
    )(x, w1t, b1t, w2t, b2t)


def mlp_forward(x, w1, b1, w2, b2, *, tm=2048):
    # Module parity: (B, out_dim).  The kernel emits the lane-dense (out_dim, B)
    # layout (unmasked stores, dense writeback DMA); this final transpose only
    # touches the small 10-wide result.  Use mlp_forward_t() to skip it entirely.
    return mlp_forward_t(x, w1, b1, w2, b2, tm=tm).T


def init_params(key, in_dim=20, hidden_dim=256, out_dim=10):
    # Deterministic init mirroring nn.Linear's uniform(-1/sqrt(fan_in), 1/sqrt(fan_in)).
    k1, k2, k3, k4 = jax.random.split(key, 4)
    bound1 = 1.0 / jnp.sqrt(in_dim)
    bound2 = 1.0 / jnp.sqrt(hidden_dim)
    w1 = jax.random.uniform(k1, (in_dim, hidden_dim), jnp.float32, -bound1, bound1)
    b1 = jax.random.uniform(k2, (1, hidden_dim), jnp.float32, -bound1, bound1)
    w2 = jax.random.uniform(k3, (hidden_dim, out_dim), jnp.float32, -bound2, bound2)
    b2 = jax.random.uniform(k4, (1, out_dim), jnp.float32, -bound2, bound2)
    return w1, b1, w2, b2


if __name__ == "__main__":
    key = jax.random.PRNGKey(0)
    kx, kp = jax.random.split(key)
    B = 64
    x = jax.random.normal(kx, (B, 20), jnp.float32)
    w1, b1, w2, b2 = init_params(kp)

    out = mlp_forward(x, w1, b1, w2, b2)
    jax.block_until_ready(out)
    assert out.shape == (B, 10)

    # Reference with the same mixed-precision math as the kernel.
    epi = _epilogue_dtype()
    xb, w1b, w2b = (x.astype(jnp.bfloat16), w1.astype(jnp.bfloat16),
                    w2.astype(jnp.bfloat16))
    h_ref = jnp.dot(xb, w1b, preferred_element_type=jnp.float32)
    h_ref = jnp.maximum(h_ref.astype(epi) + b1.astype(epi), 0.0)
    ref = jnp.dot(h_ref.astype(jnp.bfloat16), w2b,
                  preferred_element_type=jnp.float32) + b2
    assert jnp.allclose(out, ref, atol=1e-2, rtol=1e-2)

    # Loose sanity check against the full-f32 module semantics.
    ref_f32 = jnp.maximum(x @ w1 + b1, 0.0) @ w2 + b2
    assert jnp.allclose(out, ref_f32, atol=1e-1, rtol=1e-1)

    print("KERNEL_OK")
</pallas_src>

<mosaic_0001>
module attributes {stable_mosaic.version = 11 : i64} {
  func.func @mlp_kernel(%arg0: i32, %arg1: memref<64x20xf32, #tpu.memory_space<vmem>>, %arg2: memref<256x20xbf16, #tpu.memory_space<vmem>>, %arg3: memref<256x1xf32, #tpu.memory_space<vmem>>, %arg4: memref<10x256xbf16, #tpu.memory_space<vmem>>, %arg5: memref<10x1xf32, #tpu.memory_space<vmem>>, %arg6: memref<10x64xf32, #tpu.memory_space<vmem>>) attributes {dimension_semantics = [#tpu.dimension_semantics<parallel>], iteration_bounds = array<i64: 1>, scalar_prefetch = 0 : i64, scratch_operands = 0 : i64, tpu.core_type = #tpu.core_type<tc>, window_params = [{transform_indices = @transform_0, window_bounds = array<i64: 64, 20>}, {pipeline_mode = #tpu.pipeline_mode<synchronous>, transform_indices = @transform_1, window_bounds = array<i64: 256, 20>}, {pipeline_mode = #tpu.pipeline_mode<synchronous>, transform_indices = @transform_2, window_bounds = array<i64: 256, 1>}, {pipeline_mode = #tpu.pipeline_mode<synchronous>, transform_indices = @transform_3, window_bounds = array<i64: 10, 256>}, {pipeline_mode = #tpu.pipeline_mode<synchronous>, transform_indices = @transform_4, window_bounds = array<i64: 10, 1>}, {transform_indices = @transform_5, window_bounds = array<i64: 10, 64>}]} {
    %c0 = arith.constant 0 : index
    %c0_0 = arith.constant 0 : index
    %0 = vector.load %arg1[%c0, %c0_0] : memref<64x20xf32, #tpu.memory_space<vmem>>, vector<64x20xf32>
    %1 = arith.truncf %0 : vector<64x20xf32> to vector<64x20xbf16>
    %c0_1 = arith.constant 0 : index
    %c0_2 = arith.constant 0 : index
    %2 = vector.load %arg2[%c0_1, %c0_2] : memref<256x20xbf16, #tpu.memory_space<vmem>>, vector<256x20xbf16>
    %cst = arith.constant dense<0.000000e+00> : vector<256x64xf32>
    %3 = tpu.matmul %2, %1, %cst {dimension_numbers = #tpu.dot_dimension_numbers<[1], [1], [0], [0], [0, 0, 1, 0], [], []>} : vector<256x20xbf16>, vector<64x20xbf16>, vector<256x64xf32> -> vector<256x64xf32>
    %4 = arith.truncf %3 : vector<256x64xf32> to vector<256x64xbf16>
    %c0_3 = arith.constant 0 : index
    %c0_4 = arith.constant 0 : index
    %5 = vector.load %arg3[%c0_3, %c0_4] : memref<256x1xf32, #tpu.memory_space<vmem>>, vector<256x1xf32>
    %6 = arith.truncf %5 : vector<256x1xf32> to vector<256x1xbf16>
    %7 = vector.broadcast %6 : vector<256x1xbf16> to vector<256x64xbf16>
    %8 = arith.addf %4, %7 : vector<256x64xbf16>
    %cst_5 = arith.constant 0.000000e+00 : bf16
    %9 = vector.broadcast %cst_5 : bf16 to vector<256x64xbf16>
    %10 = arith.maximumf %8, %9 : vector<256x64xbf16>
    %c0_6 = arith.constant 0 : index
    %c0_7 = arith.constant 0 : index
    %11 = vector.load %arg4[%c0_6, %c0_7] : memref<10x256xbf16, #tpu.memory_space<vmem>>, vector<10x256xbf16>
    %cst_8 = arith.constant dense<0.000000e+00> : vector<10x64xf32>
    %12 = tpu.matmul %11, %10, %cst_8 {dimension_numbers = #tpu.dot_dimension_numbers<[1], [0], [0], [1], [0, 0, 1, 1], [], []>} : vector<10x256xbf16>, vector<256x64xbf16>, vector<10x64xf32> -> vector<10x64xf32>
    %c0_9 = arith.constant 0 : index
    %c0_10 = arith.constant 0 : index
    %13 = vector.load %arg5[%c0_9, %c0_10] : memref<10x1xf32, #tpu.memory_space<vmem>>, vector<10x1xf32>
    %14 = vector.broadcast %13 : vector<10x1xf32> to vector<10x64xf32>
    %15 = arith.addf %12, %14 : vector<10x64xf32>
    %c0_11 = arith.constant 0 : index
    %c0_12 = arith.constant 0 : index
    %16 = vector.load %arg6[%c0_11, %c0_12] : memref<10x64xf32, #tpu.memory_space<vmem>>, vector<10x64xf32>
    tpu.vector_store %arg6[%c0_11, %c0_12], %15 {strides = array<i32>} : memref<10x64xf32, #tpu.memory_space<vmem>>, vector<10x64xf32>,
    return
  }
  func.func @transform_0(%arg0: i32) -> (i32, i32) {
    %c0_i32 = arith.constant 0 : i32
    %c0_i32_0 = arith.constant 0 : i32
    return %arg0, %c0_i32 : i32, i32
  }
  func.func @transform_1(%arg0: i32) -> (i32, i32) {
    %c0_i32 = arith.constant 0 : i32
    %c0_i32_0 = arith.constant 0 : i32
    %c0_i32_1 = arith.constant 0 : i32
    return %c0_i32, %c0_i32_0 : i32, i32
  }
  func.func @transform_2(%arg0: i32) -> (i32, i32) {
    %c0_i32 = arith.constant 0 : i32
    %c0_i32_0 = arith.constant 0 : i32
    %c0_i32_1 = arith.constant 0 : i32
    return %c0_i32, %c0_i32_0 : i32, i32
  }
  func.func @transform_3(%arg0: i32) -> (i32, i32) {
    %c0_i32 = arith.constant 0 : i32
    %c0_i32_0 = arith.constant 0 : i32
    %c0_i32_1 = arith.constant 0 : i32
    return %c0_i32, %c0_i32_0 : i32, i32
  }
  func.func @transform_4(%arg0: i32) -> (i32, i32) {
    %c0_i32 = arith.constant 0 : i32
    %c0_i32_0 = arith.constant 0 : i32
    %c0_i32_1 = arith.constant 0 : i32
    return %c0_i32, %c0_i32_0 : i32, i32
  }
  func.func @transform_5(%arg0: i32) -> (i32, i32) {
    %c0_i32 = arith.constant 0 : i32
    %c0_i32_0 = arith.constant 0 : i32
    return %c0_i32, %arg0 : i32, i32
  }
}

</mosaic_0001>

<bundles_post_ra>
// kernel: tpu_custom_call.1
= control target key start
LH: loop header
LB: loop body
LE: loop exit
PB: predicated region body
PF: predicated region fallthrough
CT: control target
= control target key end

     0   :  { %vm146_vm0 = vcmask 162816   ;;  %v796_v5 = vmov 0   ;;  %s1103_s0 = inlined_call_operand.vmem [shape: f32[64,20], index: 0, kind: input, shape index: {}]   ;;  %s1104_s1 = inlined_call_operand.vmem [shape: bf16[256,20], index: 1, kind: input, shape index: {}]   ;;  %s1105_s2 = inlined_call_operand.vmem [shape: f32[256,1], index: 2, kind: input, shape index: {}]   ;;  %s1106_s3 = inlined_call_operand.vmem [shape: bf16[10,256], index: 3, kind: input, shape index: {}]   ;;  %s1107_s4 = inlined_call_operand.vmem [shape: f32[10,1], index: 4, kind: input, shape index: {}]   ;;  %s1108_s5 = inlined_call_operand.hbm [shape: f32[10,64], index: 5, kind: output, shape index: {}]  }
   0x1   :  { %v28_v0 = vld [vmem:[%s1103_s0 + $0x30] sm:$0xff]  ;;  %v29_v1 = vld [vmem:[%s1103_s0 + $0x38] sm:$0xff]  ;;  %v26_v2 = vld [vmem:[%s1103_s0 + $0x20] sm:$0xff]  ;;  %754 = vset.pattern.permute.xlu1 %v796_v5  ;;  %753 = vset.pattern.permute.xlu0 %v796_v5 }
   0x2   :  { %v33_v3 = vpack.c.bf16 %v29_v1, %v28_v0  ;;  %v27_v4 = vld [vmem:[%s1103_s0 + $0x28] sm:$0xff]  ;;  %v755_v8 = vld [vmem:[%s1104_s1] sm:$0xff]   ;;  %v24_v9 = vld [vmem:[%s1103_s0 + $0x10] sm:$0xff] }
   0x3   :  { %v32_v6 = vpack.c.bf16 %v27_v4, %v26_v2  ;;  %v25_v10 = vld [vmem:[%s1103_s0 + $0x18] sm:$0xff]  ;;  %713 = vmatprep.mubr.msk.bf16.mxu0 %vm146_vm0, %v755_v8  ;;  %v22_v13 = vld [vmem:[%s1103_s0] sm:$0xff]  ;;  %v23_v14 = vld [vmem:[%s1103_s0 + $0x8] sm:$0xff] }
   0x4   :  { %745 = vmatprep.subr.msk.bf16.mxu0 %vm146_vm0, %v33_v3  ;;  %v205_v7 = vsel %vm146_vm0, %v33_v3, 0  ;;  %v31_v12 = vpack.c.bf16 %v25_v10, %v24_v9  ;;  %v412_v15 = vld [vmem:[%s1105_s2 + $0xe0] sm:$0xff]  ;;  %v30_v17 = vpack.c.bf16 %v23_v14, %v22_v13  ;;  %v413_v18 = vld [vmem:[%s1105_s2 + $0xe8] sm:$0xff]  ;;  %v394_v23 = vld [vmem:[%s1105_s2 + $0x50] sm:$0xff] }
   0x5   :  { %706 = vmatpush3.bf16.xpose.msra.mxu0 %v205_v7  ;;  %v202_v11 = vsel %vm146_vm0, %v32_v6, 0  ;;  %v396_v19 = vld [vmem:[%s1105_s2 + $0x60] sm:$0xff]  ;;  %v397_v20 = vld [vmem:[%s1105_s2 + $0x68] sm:$0xff]  ;;  %v430_v21 = vpack.c.bf16 %v413_v18, %v412_v15  ;;  %v395_v24 = vld [vmem:[%s1105_s2 + $0x58] sm:$0xff] }
   0x6   :  { %746 = vmatprep.subr.msk.bf16.mxu0 %vm146_vm0, %v32_v6  ;;  %v199_v16 = vsel %vm146_vm0, %v31_v12, 0  ;;  %v422_v22 = vpack.c.bf16 %v397_v20, %v396_v19  ;;  %v421_v25 = vpack.c.bf16 %v395_v24, %v394_v23  ;;  %v414_v26 = vld [vmem:[%s1105_s2 + $0xf0] sm:$0xff]  ;;  %v415_v27 = vld [vmem:[%s1105_s2 + $0xf8] sm:$0xff]  ;;  %v196_v29 = vsel %vm146_vm0, %v30_v17, 0  ;;  %v392_v30 = vld [vmem:[%s1105_s2 + $0x40] sm:$0xff] }
   0x7   :  { %504 = vperm.xlu1 %754, %v430_v21   ;;  %v398_v28 = vld [vmem:[%s1105_s2 + $0x70] sm:$0xff]  ;;  %v393_v31 = vld [vmem:[%s1105_s2 + $0x48] sm:$0xff]  ;;  %v431_v32 = vpack.c.bf16 %v415_v27, %v414_v26  ;;  %v399_v33 = vld [vmem:[%s1105_s2 + $0x78] sm:$0xff] }
   0x8   :  { %v423_v34 = vpack.c.bf16 %v399_v33, %v398_v28  ;;  %v420_v35 = vpack.c.bf16 %v393_v31, %v392_v30  ;;  %v410_v36 = vld [vmem:[%s1105_s2 + $0xd0] sm:$0xff]  ;;  %v411_v37 = vld [vmem:[%s1105_s2 + $0xd8] sm:$0xff] }
   0x9   :  { %509 = vperm.xlu0 %753, %v431_v32   ;;  %v390_v38 = vld [vmem:[%s1105_s2 + $0x30] sm:$0xff]  ;;  %v391_v39 = vld [vmem:[%s1105_s2 + $0x38] sm:$0xff] }
   0xb   :  { %464 = vperm.xlu1 %754, %v422_v22  }
   0xd   :  { %708 = vmatpush3.bf16.xpose.msra.mxu0 %v202_v11 }
   0xe   :  { %747 = vmatprep.subr.msk.bf16.mxu0 %vm146_vm0, %v31_v12 }
   0xf   :  { %459 = vperm.xlu1 %754, %v421_v25  }
  0x15   :  { %710 = vmatpush3.bf16.xpose.msra.mxu0 %v199_v16 }
  0x16   :  { %748 = vmatprep.subr.msk.bf16.mxu0 %vm146_vm0, %v30_v17 }
  0x1d   :  { %712 = vmatpush3.bf16.xpose.msra.mxu0 %v196_v29 }
  0x1e   :  { %10 = vsyncpa [#allocation3], 0  ;;  %v756_v40 = vld [vmem:[%s1104_s1 + $0x8] sm:$0xff]   ;;  %469 = vperm.xlu0 %753, %v423_v34   ;;  %v429_v41 = vpack.c.bf16 %v411_v37, %v410_v36  ;;  %v757_v42 = vld [vmem:[%s1104_s1 + $0x10] sm:$0xff]   ;;  %454 = vperm.xlu1 %754, %v420_v35   ;;  %v419_v43 = vpack.c.bf16 %v391_v39, %v390_v38  ;;  %vm609_vm1 = vcmask 523264   ;;  %s797_s6 = smov [#allocation2]  }
  0x1f   :  { %v408_v44 = vld [vmem:[%s1105_s2 + $0xc0] sm:$0xff]  ;;  %v409_v45 = vld [vmem:[%s1105_s2 + $0xc8] sm:$0xff]  ;;  %v406_v50 = vld [vmem:[%s1105_s2 + $0xb0] sm:$0xff]  ;;  %s618_s7 = sshll.u32 %s797_s6, 4  ;;  %vm611_vm2 = vcmask 517120   ;;  %s619_s7 = int_to_ptr.vmem [resolvable:$true] %s618_s7 }
  0x20   :  { %v388_v46 = vld [vmem:[%s1105_s2 + $0x20] sm:$0xff]  ;;  %v389_v47 = vld [vmem:[%s1105_s2 + $0x28] sm:$0xff]  ;;  %v428_v48 = vpack.c.bf16 %v409_v45, %v408_v44  ;;  %v407_v51 = vld [vmem:[%s1105_s2 + $0xb8] sm:$0xff]  ;;  %p779_p1 = scmp.lt.s32.totalorder %s619_s7, %s619_s7 }
  0x21   :  { %v418_v49 = vpack.c.bf16 %v389_v47, %v388_v46  ;;  %v386_v52 = vld [vmem:[%s1105_s2 + $0x10] sm:$0xff]  ;;  %v387_v53 = vld [vmem:[%s1105_s2 + $0x18] sm:$0xff]  ;;  %v427_v55 = vpack.c.bf16 %v407_v51, %v406_v50  ;;  %v759_v56 = vld [vmem:[%s1104_s1 + $0x20] sm:$0xff]  }
  0x22   :  { %499 = vperm.xlu0 %753, %v429_v41   ;;  %449 = vperm.xlu1 %754, %v419_v43   ;;  %v758_v54 = vld [vmem:[%s1104_s1 + $0x18] sm:$0xff]   ;;  %v417_v57 = vpack.c.bf16 %v387_v53, %v386_v52  ;;  %v404_v58 = vld [vmem:[%s1105_s2 + $0xa0] sm:$0xff]  ;;  %v405_v59 = vld [vmem:[%s1105_s2 + $0xa8] sm:$0xff] }
  0x23   :  { %v384_v60 = vld [vmem:[%s1105_s2] sm:$0xff]  ;;  %v385_v61 = vld [vmem:[%s1105_s2 + $0x8] sm:$0xff]  ;;  %v426_v62 = vpack.c.bf16 %v405_v59, %v404_v58  ;;  %v402_v0 = vld [vmem:[%s1105_s2 + $0x90] sm:$0xff] }
  0x24   :  { %714 = vmatmul.mubr.msk.bf16.vlgmr.msra.gmra.mxu0 %vm146_vm0, %v756_v40  ;;  %v416_v63 = vpack.c.bf16 %v385_v61, %v384_v60  ;;  %v403_v1 = vld [vmem:[%s1105_s2 + $0x98] sm:$0xff]  ;;  %v760_v2 = vld [vmem:[%s1104_s1 + $0x28] sm:$0xff]   ;;  %v761_v4 = vld [vmem:[%s1104_s1 + $0x30] sm:$0xff]  }
  0x25   :  { %717 = vmatprep.mubr.msk.bf16.mxu0 %vm146_vm0, %v757_v42  ;;  %v425_v3 = vpack.c.bf16 %v403_v1, %v402_v0  ;;  %v400_v6 = vld [vmem:[%s1105_s2 + $0x80] sm:$0xff]  ;;  %v401_v7 = vld [vmem:[%s1105_s2 + $0x88] sm:$0xff]  ;;  %v762_v10 = vld [vmem:[%s1104_s1 + $0x38] sm:$0xff]  }
  0x26   :  { %494 = vperm.xlu0 %753, %v428_v48   ;;  %444 = vperm.xlu1 %754, %v418_v49   ;;  %v547_v8 = vld [vmem:[%s1107_s4 + $0x8] sm:$0x3]  ;;  %v424_v9 = vpack.c.bf16 %v401_v7, %v400_v6  ;;  %v763_v11 = vld [vmem:[%s1104_s1 + $0x40] sm:$0xff]   ;;  %v765_v14 = vld [vmem:[%s1104_s1 + $0x50] sm:$0xff]  }
  0x27   :  { %v546_v12 = vld [vmem:[%s1107_s4] sm:$0xff]  ;;  %v764_v13 = vld [vmem:[%s1104_s1 + $0x48] sm:$0xff]   ;;  %v766_v15 = vld [vmem:[%s1104_s1 + $0x58] sm:$0xff]  }
  0x28   :  { %v767_v16 = vld [vmem:[%s1104_s1 + $0x60] sm:$0xff]   ;;  %v768_v17 = vld [vmem:[%s1104_s1 + $0x68] sm:$0xff]   ;;  %v769_v18 = vld [vmem:[%s1104_s1 + $0x70] sm:$0xff]  }
  0x29   :  { %v770_v19 = vld [vmem:[%s1104_s1 + $0x78] sm:$0xff]   ;;  %v773_v20 = vld [vmem:[%s1106_s3 + $0x4] ss:$8 sps:$4 sm:$0x1f]  }
  0x2a   :  { %489 = vperm.xlu0 %753, %v427_v55   ;;  %439 = vperm.xlu1 %754, %v417_v57  }
  0x2b   :  { %600 = vmatprep.mubr.bf16.mxu1 %v773_v20 }
  0x2c   :  { %718 = vmatmul.mubr.msk.bf16.gmra.mxu0 %vm146_vm0, %v758_v54 }
  0x2d   :  { %721 = vmatprep.mubr.msk.bf16.mxu0 %vm146_vm0, %v759_v56 }
  0x2e   :  { %484 = vperm.xlu0 %753, %v426_v62   ;;  %434 = vperm.xlu1 %754, %v416_v63  }
  0x32   :  { %479 = vperm.xlu0 %753, %v425_v3   ;;  %555 = vperm.xlu1 %754, %v547_v8  }
  0x34   :  { %722 = vmatmul.mubr.msk.bf16.gmra.mxu0 %vm146_vm0, %v760_v2 }
  0x35   :  { %725 = vmatprep.mubr.msk.bf16.mxu0 %vm146_vm0, %v761_v4 }
  0x36   :  { %474 = vperm.xlu0 %753, %v424_v9  }
  0x3a   :  { %550 = vperm.xlu0 %753, %v546_v12  }
  0x3c   :  { %726 = vmatmul.mubr.msk.bf16.gmra.mxu0 %vm146_vm0, %v762_v10 }
  0x3d   :  { %729 = vmatprep.mubr.msk.bf16.mxu0 %vm146_vm0, %v763_v11 }
  0x44   :  { %730 = vmatmul.mubr.msk.bf16.gmra.mxu0 %vm146_vm0, %v764_v13 }
  0x45   :  { %733 = vmatprep.mubr.msk.bf16.mxu0 %vm146_vm0, %v765_v14 }
  0x4c   :  { %734 = vmatmul.mubr.msk.bf16.gmra.mxu0 %vm146_vm0, %v766_v15 }
  0x4d   :  { %737 = vmatprep.mubr.msk.bf16.mxu0 %vm146_vm0, %v767_v16 }
  0x54   :  { %738 = vmatmul.mubr.msk.bf16.gmra.mxu0 %vm146_vm0, %v768_v17 }
  0x55   :  { %741 = vmatprep.mubr.msk.bf16.mxu0 %vm146_vm0, %v769_v18 }
  0x5c   :  { %742 = vmatmul.mubr.msk.bf16.gmra.mxu0 %vm146_vm0, %v770_v19 }
  0x82   :  { %v505_v49 = vpop.permute.xlu1 %504 }
  0x84   :  { %v510_v46 = vpop.permute.xlu0 %509 }
  0x86   :  { %v465_v54 = vpop.permute.xlu1 %464 }
  0x8a   :  { %v460_v59 = vpop.permute.xlu1 %459 }
  0x99   :  { %v470_v51 = vpop.permute.xlu0 %469  ;;  %v455_v4 = vpop.permute.xlu1 %454 }
  0x9d   :  { %v500_v56 = vpop.permute.xlu0 %499  ;;  %v450_v18 = vpop.permute.xlu1 %449 }
  0xa1   :  { %v495_v62 = vpop.permute.xlu0 %494 }
  0xa5   :  { %v490_v12 = vpop.permute.xlu0 %489 }
  0xe4   :  { %v1033_v21 = vpop.f32.mrf.mxu0 }
  0xe6   :  { %v1035_v22 = vpop.f32.mrf.mxu0 }
  0xe8   :  { %v1037_v23 = vpop.f32.mrf.mxu0 }
  0xe9   :  { %v369_v24 = vpack.c.bf16 %v1037_v23, %v1033_v21  ;;  %v771_v23 = vld [vmem:[%s1106_s3] ss:$8 sps:$4 sm:$0x1f]   ;;  %s774_s3 = scalar_lea.vmem %s619_s7, 256 }
  0xea   :  { %v1041_v25 = vpop.f32.mrf.mxu0  ;;  %p775_p0 = scmp.ne.s32.totalorder %s619_s7, %s774_s3  ;;  %p780_p2 = scmp.lt.s32.totalorder %s774_s3, %s774_s3 }
  0xeb   :  { %v368_v26 = vpack.c.bf16 %v1041_v25, %v1035_v22 }
  0xec   :  { %v1045_v27 = vpop.f32.mrf.mxu0  ;;  %p781_p3 = por %p780_p2, %p779_p1 }
  0xee   :  { %v1047_v28 = vpop.f32.mrf.mxu0  ;;  %p782_p4 = pnand %p781_p3, %p775_p0 }
  0xf0   :  { %v1049_v29 = vpop.f32.mrf.mxu0 }
  0xf1   :  { %v371_v30 = vpack.c.bf16 %v1049_v29, %v1045_v27 }
  0xf2   :  { %v1053_v31 = vpop.f32.mrf.mxu0 }
  0xf3   :  { %v370_v32 = vpack.c.bf16 %v1053_v31, %v1047_v28 }
  0xf4   :  { %v723_v33 = vpop.f32.mrf.mxu0 }
  0xf6   :  { %v273_v34 = vpop.f32.mrf.mxu0 }
  0xf8   :  { %v724_v35 = vpop.f32.mrf.mxu0 }
  0xf9   :  { %v373_v11 = vpack.c.bf16 %v724_v35, %v723_v33  ;;  %v485_v35 = vpop.permute.xlu0 %484 }
  0xfa   :  { %v276_v36 = vpop.f32.mrf.mxu0 }
  0xfb   :  { %v517_v19 = vadd.bf16 %v460_v59, %v373_v11  ;;  %v372_v20 = vpack.c.bf16 %v276_v36, %v273_v34  ;;  %v515_v34 = vadd.bf16 %v450_v18, %v371_v30 }
  0xfc   :  { %v727_v37 = vpop.f32.mrf.mxu0 }
  0xfd   :  { %v480_v36 = vpop.permute.xlu0 %479 }
  0xfe   :  { %v289_v38 = vpop.f32.mrf.mxu0 }
 0x100   :  { %v728_v39 = vpop.f32.mrf.mxu0 }
 0x101   :  { %v375_v60 = vpack.c.bf16 %v728_v39, %v727_v37 }
 0x102   :  { %v292_v40 = vpop.f32.mrf.mxu0 }
 0x103   :  { %v519_v1 = vadd.bf16 %v470_v51, %v375_v60  ;;  %v374_v2 = vpack.c.bf16 %v292_v40, %v289_v38  ;;  %v516_v40 = vadd.bf16 %v455_v4, %v372_v20 }
 0x104   :  { %v1057_v41 = vpop.f32.mrf.mxu0 }
 0x105   :  { %v518_v13 = vadd.bf16 %v465_v54, %v374_v2  ;;  %v535_v14 = vmax.bf16 %v796_v5, %v519_v1 }
 0x106   :  { %v1059_v42 = vpop.f32.mrf.mxu0 }
 0x107   :  { %v534_v37 = vmax.bf16 %v796_v5, %v518_v13 }
 0x108   :  { %v1061_v43 = vpop.f32.mrf.mxu0 }
 0x10a   :  { %v1063_v44 = vpop.f32.mrf.mxu0 }
 0x10b   :  { %v376_v29 = vpack.c.bf16 %v1063_v44, %v1059_v42 }
 0x10c   :  { %v735_v45 = vpop.f32.mrf.mxu0 }
 0x10e   :  { %v321_v47 = vpop.f32.mrf.mxu0 }
 0x110   :  { %v736_v48 = vpop.f32.mrf.mxu0 }
 0x111   :  { %v379_v38 = vpack.c.bf16 %v736_v48, %v735_v45  ;;  %v532_v45 = vmax.bf16 %v796_v5, %v516_v40  ;;  %v377_v48 = vpack.c.bf16 %v1061_v43, %v1057_v41 }
 0x112   :  { %v324_v50 = vpop.f32.mrf.mxu0 }
 0x113   :  { %v523_v51 = vadd.bf16 %v490_v12, %v379_v38  ;;  %v521_v27 = vadd.bf16 %v480_v36, %v377_v48 }
 0x114   :  { %v739_v52 = vpop.f32.mrf.mxu0 }
 0x115   :  { %v537_v31 = vmax.bf16 %v796_v5, %v521_v27 }
 0x116   :  { %v337_v53 = vpop.f32.mrf.mxu0 }
 0x118   :  { %v740_v55 = vpop.f32.mrf.mxu0 }
 0x119   :  { %v381_v6 = vpack.c.bf16 %v740_v55, %v739_v52  ;;  %v378_v52 = vpack.c.bf16 %v324_v50, %v321_v47  ;;  %v539_v55 = vmax.bf16 %v796_v5, %v523_v51  ;;  %v531_v50 = vmax.bf16 %v796_v5, %v515_v34 }
 0x11a   :  { %v340_v57 = vpop.f32.mrf.mxu0 }
 0x11b   :  { %v525_v15 = vadd.bf16 %v500_v56, %v381_v6  ;;  %v380_v16 = vpack.c.bf16 %v340_v57, %v337_v53  ;;  %v522_v54 = vadd.bf16 %v485_v35, %v378_v52  ;;  %v475_v57 = vpop.permute.xlu0 %474 }
 0x11c   :  { %v743_v58 = vpop.f32.mrf.mxu0  ;;  %v520_v28 = vadd.bf16 %v475_v57, %v376_v29 }
 0x11d   :  { %v524_v39 = vadd.bf16 %v495_v62, %v380_v16  ;;  %v541_v33 = vmax.bf16 %v796_v5, %v525_v15  ;;  %v538_v30 = vmax.bf16 %v796_v5, %v522_v54 }
 0x11e   :  { %v353_v61 = vpop.f32.mrf.mxu0  ;;  %v536_v44 = vmax.bf16 %v796_v5, %v520_v28 }
 0x11f   :  { %v540_v53 = vmax.bf16 %v796_v5, %v524_v39 }
 0x120   :  { %v744_v63 = vpop.f32.mrf.mxu0 }
 0x121   :  { %v383_v0 = vpack.c.bf16 %v744_v63, %v743_v58 }
 0x122   :  { %v356_v3 = vpop.f32.mrf.mxu0 }
 0x123   :  { %v382_v7 = vpack.c.bf16 %v356_v3, %v353_v61  ;;  %v527_v8 = vadd.bf16 %v510_v46, %v383_v0  ;;  %v533_v46 = vmax.bf16 %v796_v5, %v517_v19  ;;  %v551_v61 = vpop.permute.xlu0 %550 }
 0x125   :  { %v526_v9 = vadd.bf16 %v505_v49, %v382_v7  ;;  %v543_v10 = vmax.bf16 %v796_v5, %v527_v8  ;;  %v445_v49 = vpop.permute.xlu1 %444 }
 0x126   :  { %v514_v47 = vadd.bf16 %v445_v49, %v370_v32 }
 0x127   :  { %683 = vmatprep.subr.bf16.mxu1 %v543_v10  ;;  %v542_v17 = vmax.bf16 %v796_v5, %v526_v9 }
 0x128   :  { %684 = vmatpush3.bf16.msra.mxu1 %v535_v14  ;;  %v530_v43 = vmax.bf16 %v796_v5, %v514_v47 }
 0x129   :  { %685 = vmatprep.subr.bf16.mxu1 %v542_v17  ;;  %v440_v56 = vpop.permute.xlu1 %439 }
 0x12a   :  { %v513_v41 = vadd.bf16 %v440_v56, %v369_v24 }
 0x12c   :  { %686 = vmatpush3.bf16.msra.mxu1 %v534_v37  ;;  %v529_v42 = vmax.bf16 %v796_v5, %v513_v41 }
 0x12d   :  { %687 = vmatprep.subr.bf16.mxu1 %v541_v33  ;;  %v435_v58 = vpop.permute.xlu1 %434 }
 0x12e   :  { %v512_v32 = vadd.bf16 %v435_v58, %v368_v26 }
 0x130   :  { %688 = vmatpush3.bf16.msra.mxu1 %v533_v46  ;;  %v528_v21 = vmax.bf16 %v796_v5, %v512_v32 }
 0x131   :  { %689 = vmatprep.subr.bf16.mxu1 %v540_v53  ;;  %v556_v63 = vpop.permute.xlu1 %555 }
 0x134   :  { %690 = vmatpush3.bf16.msra.mxu1 %v532_v45 }
 0x135   :  { %691 = vmatprep.subr.bf16.mxu1 %v539_v55 }
 0x138   :  { %692 = vmatpush3.bf16.msra.mxu1 %v531_v50 }
 0x139   :  { %693 = vmatprep.subr.bf16.mxu1 %v538_v30 }
 0x13c   :  { %694 = vmatpush3.bf16.msra.mxu1 %v530_v43 }
 0x13d   :  { %695 = vmatprep.subr.bf16.mxu1 %v537_v31 }
 0x140   :  { %696 = vmatpush3.bf16.msra.mxu1 %v529_v42 }
 0x141   :  { %697 = vmatprep.subr.bf16.mxu1 %v536_v44 }
 0x144   :  { %698 = vmatpush3.bf16.msra.mxu1 %v528_v21 }
 0x147   :  { %601 = vmatmul.mubr.bf16.vlgmr.msra.gmra.mxu1 %v771_v23 }
 0x207   :  { %v699_v24 = vpop.f32.mrf.mxu1 }
 0x209   :  { %v700_v59 = vpop.f32.mrf.mxu1 }
 0x20a   :  { %v701_v60 = vadd.f32 %v700_v59, %v699_v24 }
 0x20b   :  { %v702_v22 = vpop.f32.mrf.mxu1 }
 0x20c   :  { %v603_v25 = vadd.f32 %v701_v60, %v551_v61 }
 0x20d   :  { %v703_v26 = vpop.f32.mrf.mxu1 }
 0x20e   :  { %610 = vst.msk [vmem:[#allocation2] sm:$0xff] %vm609_vm1, %v603_v25  ;;  %v704_v62 = vadd.f32 %v703_v26, %v702_v22 }
 0x210   :  { %v606_v5 = vadd.f32 %v704_v62, %v556_v63 }
 0x212   :  { %612 = vst.msk [vmem:[#allocation2 + $0x8] sm:$0x3] %vm611_vm2, %v606_v5 }
 0x213   :  { %785 = shalt.err (!%p782_p4)
}
 0x214   :  { %s798_s8 = smov 128   ;;  %s799_s9 = smov 8  }
 0x215   :  { %624 = dma.vmem_to_hbm [thread:$0]  %s619_s7, 256, %s1108_s5, [#allocation3], %s798_s8, %s798_s8, %s799_s9  }
 0x216   :  { %794 = dma.done.wait [#allocation3], 256  }
 0x217   :  { %795 = vsyncadd [#allocation3], 4294967040 }
 0x218   :  { %628 = vsyncpa [#allocation3], 1 }

</bundles_post_ra>
